<compile_context>
chip_gen: v7x
topology: tpu7x:2x2x1
jax: 0.10.0
libtpu: 0.0.40
codegen_flags: <defaults>
</compile_context>

<pallas_src>
import functools

import jax
import jax.numpy as jnp
from jax.experimental import pallas as pl
from jax.experimental.pallas import tpu as pltpu


def _linear_kernel(wt_ref, b_ref, x_ref, o_ref):
    # wt_ref: [IN, OUT]  (weight.T, full-array block, resident across steps)
    # b_ref:  [1, OUT]
    # x_ref:  [TB, IN]   (natural input layout: one batch tile per grid step)
    # o_ref:  [TB, OUT]  (natural output layout; ragged last tile OK)
    acc = jnp.dot(x_ref[...], wt_ref[...], preferred_element_type=jnp.float32)
    o_ref[...] = (acc + b_ref[...]).astype(o_ref.dtype)


def _round_up(n, m):
    return ((n + m - 1) // m) * m


@functools.partial(jax.jit, static_argnames=("block_batch",))
def mock_model_forward(x, weight, bias, *, block_batch=8192):
    """Equivalent of MockModel.forward: nn.Linear(10, 2) applied to x.

    Args:
      x:      [batch, 10] float32
      weight: [2, 10]     float32  (PyTorch nn.Linear weight layout)
      bias:   [2]         float32
      block_batch: batch tile size (rounded up to a multiple of 8 sublanes).
    Returns:
      [batch, 2] float32
    """
    batch, in_features = x.shape
    out_features = weight.shape[0]

    # Batch tile: multiple of 8 (sublane axis), capped by the rounded batch.
    tb = min(_round_up(block_batch, 8), _round_up(batch, 8))
    grid = (pl.cdiv(batch, tb),)  # ragged last block handled by Pallas

    # Tiny layout fixups done once in the wrapper (80 / 8 bytes, negligible).
    w_t = weight.T                          # [in, out]
    b_row = bias.reshape(1, out_features)   # [1, out]

    itemsize = x.dtype.itemsize
    cost = pl.CostEstimate(
        flops=2 * batch * in_features * out_features,
        bytes_accessed=(x.size + weight.size + bias.size
                        + batch * out_features) * itemsize,
        transcendentals=0,
    )

    # The [tb, in] / [tb, out] blocks are lane-padded to 128 in VMEM and
    # double-buffered -> ~4 * tb * 128 * 4 bytes total.  Raise the scoped
    # VMEM limit above v5e's 16 MiB default but stay under v7x's 64 MiB
    # physical VMEM.
    vmem_needed = 4 * tb * 128 * 4 + (2 << 20)
    vmem_limit = int(max(32 << 20, min(vmem_needed, 60 << 20)))

    out = pl.pallas_call(
        _linear_kernel,
        out_shape=jax.ShapeDtypeStruct((batch, out_features), x.dtype),
        grid=grid,
        in_specs=[
            # Weight / bias: full-array blocks, resident across all grid steps.
            pl.BlockSpec((in_features, out_features), lambda i: (0, 0)),
            pl.BlockSpec((1, out_features), lambda i: (0, 0)),
            # x: one natural-layout batch tile per grid step (auto double-buffered).
            pl.BlockSpec((tb, in_features), lambda i: (i, 0)),
        ],
        out_specs=pl.BlockSpec((tb, out_features), lambda i: (i, 0)),
        compiler_params=pltpu.CompilerParams(
            dimension_semantics=("parallel",),   # megacore sharding on v7x
            vmem_limit_bytes=vmem_limit,
        ),
        cost_estimate=cost,
    )(w_t, b_row, x)

    return out


if __name__ == "__main__":
    key = jax.random.PRNGKey(0)
    kx, kw, kb = jax.random.split(key, 3)

    in_features, out_features = 10, 2

    # Deterministic synthetic parameters (shapes from nn.Linear(10, 2)).
    weight = jax.random.normal(kw, (out_features, in_features), dtype=jnp.float32) * 0.1
    bias = jax.random.normal(kb, (out_features,), dtype=jnp.float32) * 0.1

    # Small batch consistent with the module.
    batch = 8
    x = jax.random.normal(kx, (batch, in_features), dtype=jnp.float32)
    y = jax.block_until_ready(mock_model_forward(x, weight, bias))
    y_ref = x @ weight.T + bias
    assert y.shape == (batch, out_features)
    assert jnp.allclose(y, y_ref, atol=1e-5, rtol=1e-5)

    # Non-multiple-of-tile batch: exercises multi-step grid + ragged last block.
    batch2 = 300
    x2 = jax.random.normal(kx, (batch2, in_features), dtype=jnp.float32)
    y2 = jax.block_until_ready(mock_model_forward(x2, weight, bias, block_batch=128))
    y2_ref = x2 @ weight.T + bias
    assert y2.shape == (batch2, out_features)
    assert jnp.allclose(y2, y2_ref, atol=1e-5, rtol=1e-5)

    print("KERNEL_OK")
</pallas_src>

<mosaic_0001>
module attributes {stable_mosaic.version = 11 : i64} {
  func.func @_linear_kernel(%arg0: i32, %arg1: memref<10x2xf32, #tpu.memory_space<vmem>>, %arg2: memref<1x2xf32, #tpu.memory_space<vmem>>, %arg3: memref<8x10xf32, #tpu.memory_space<vmem>>, %arg4: memref<8x2xf32, #tpu.memory_space<vmem>>) attributes {dimension_semantics = [#tpu.dimension_semantics<parallel>], iteration_bounds = array<i64: 1>, scalar_prefetch = 0 : i64, scratch_operands = 0 : i64, tpu.core_type = #tpu.core_type<tc>, window_params = [{pipeline_mode = #tpu.pipeline_mode<synchronous>, transform_indices = @transform_0, window_bounds = array<i64: 10, 2>}, {pipeline_mode = #tpu.pipeline_mode<synchronous>, transform_indices = @transform_1, window_bounds = array<i64: 1, 2>}, {transform_indices = @transform_2, window_bounds = array<i64: 8, 10>}, {transform_indices = @transform_3, window_bounds = array<i64: 8, 2>}]} {
    %c0 = arith.constant 0 : index
    %c0_0 = arith.constant 0 : index
    %0 = vector.load %arg3[%c0, %c0_0] : memref<8x10xf32, #tpu.memory_space<vmem>>, vector<8x10xf32>
    %c0_1 = arith.constant 0 : index
    %c0_2 = arith.constant 0 : index
    %1 = vector.load %arg1[%c0_1, %c0_2] : memref<10x2xf32, #tpu.memory_space<vmem>>, vector<10x2xf32>
    %cst = arith.constant dense<0.000000e+00> : vector<8x2xf32>
    %2 = tpu.matmul %0, %1, %cst {dimension_numbers = #tpu.dot_dimension_numbers<[1], [0], [0], [1], [0, 0, 1, 1], [], []>} : vector<8x10xf32>, vector<10x2xf32>, vector<8x2xf32> -> vector<8x2xf32>
    %c0_3 = arith.constant 0 : index
    %c0_4 = arith.constant 0 : index
    %3 = vector.load %arg2[%c0_3, %c0_4] : memref<1x2xf32, #tpu.memory_space<vmem>>, vector<1x2xf32>
    %4 = vector.broadcast %3 : vector<1x2xf32> to vector<8x2xf32>
    %5 = arith.addf %2, %4 : vector<8x2xf32>
    %c0_5 = arith.constant 0 : index
    %c0_6 = arith.constant 0 : index
    %6 = vector.load %arg4[%c0_5, %c0_6] : memref<8x2xf32, #tpu.memory_space<vmem>>, vector<8x2xf32>
    tpu.vector_store %arg4[%c0_5, %c0_6], %5 {strides = array<i32>} : memref<8x2xf32, #tpu.memory_space<vmem>>, vector<8x2xf32>,
    return
  }
  func.func @transform_0(%arg0: i32) -> (i32, i32) {
    %c0_i32 = arith.constant 0 : i32
    %c0_i32_0 = arith.constant 0 : i32
    %c0_i32_1 = arith.constant 0 : i32
    return %c0_i32, %c0_i32_0 : i32, i32
  }
  func.func @transform_1(%arg0: i32) -> (i32, i32) {
    %c0_i32 = arith.constant 0 : i32
    %c0_i32_0 = arith.constant 0 : i32
    %c0_i32_1 = arith.constant 0 : i32
    return %c0_i32, %c0_i32_0 : i32, i32
  }
  func.func @transform_2(%arg0: i32) -> (i32, i32) {
    %c0_i32 = arith.constant 0 : i32
    %c0_i32_0 = arith.constant 0 : i32
    return %arg0, %c0_i32 : i32, i32
  }
  func.func @transform_3(%arg0: i32) -> (i32, i32) {
    %c0_i32 = arith.constant 0 : i32
    %c0_i32_0 = arith.constant 0 : i32
    return %arg0, %c0_i32 : i32, i32
  }
}

</mosaic_0001>

<bundles_post_ra>
// kernel: mock_model_forward.1
= control target key start
LH: loop header
LB: loop body
LE: loop exit
PB: predicated region body
PF: predicated region fallthrough
CT: control target
= control target key end

     0   :  { %vm28_vm0 = vcmask 1041408   ;;  %v129_v0 = vmov 0.0|0.0   ;;  %vm130_vm1 = vmmov 1   ;;  %vm131_vm3 = vmmov 0   ;;  %s168_s0 = inlined_call_operand.vmem [shape: f32[10,2], index: 0, kind: input, shape index: {}]   ;;  %s169_s2 = inlined_call_operand.vmem [shape: f32[8,10], index: 2, kind: input, shape index: {}]   ;;  %s170_s1 = inlined_call_operand.vmem [shape: f32[1,2], index: 1, kind: input, shape index: {}]   ;;  %s171_s3 = inlined_call_operand.vmem [shape: f32[8,2], index: 3, kind: output, shape index: {}]  }
   0x1   :  { %121 = vmatprep.subr.bf16.mxu0 %v129_v0  ;;  %v15_v1 = vld [vmem:[%s168_s0] sm:$0xff]  ;;  %v16_v2 = vld [vmem:[%s168_s0 + $0x8] sm:$0x3]  ;;  %vm123_vm2 = vmpackc.low %vm28_vm0, %vm130_vm1  ;;  %v132_v4 = vmov 0.0   ;;  %vm24_vm4 = vcmask 80896   ;;  %vm102_vm5 = vcmask 15360  }
   0x2   :  { %v122_v3 = vpack.c.bf16 %v16_v2, %v15_v1  ;;  %118 = vmatprep.mubr.msk.f32.mxu0 %vm131_vm3, %v132_v4  ;;  %v14_v5 = vld [vmem:[%s169_s2] sm:$0xff] }
   0x3   :  { %v108_v6 = vld [vmem:[%s170_s1] ss:$0 sm:$0xff] }
   0x4   :  { %124 = vmatpush3.bf16.msk.msra.mxu0 %vm123_vm2, %v122_v3 }
   0x7   :  { %119 = vmatmul.mubr.msk.f32.vlgmr.msra.gmra.mrb[0].mxu0 %vm24_vm4, %v14_v5 }
  0xda   :  { %v98_v7 = vpop.f32.mrb[0].mxu0 }
  0xdb   :  { %v99_v8 = vadd.f32 %v108_v6, %v98_v7  ;;  %v120_v9 = vpop.f32.mrb[1].mxu0 }
  0xdd   :  { %103 = vst.msk [vmem:[%s171_s3] sm:$0xff] %vm102_vm5, %v99_v8 }

</bundles_post_ra>
